<compile_context>
chip_gen: v7x
topology: tpu7x:2x2x1
jax: 0.10.0
libtpu: 0.0.40
codegen_flags: <defaults>
</compile_context>

<pallas_src>
import functools

import jax
import jax.numpy as jnp
from jax.experimental import pallas as pl
from jax.experimental.pallas import tpu as pltpu


def _round_up(x: int, m: int) -> int:
    return ((x + m - 1) // m) * m


def _linear_relu_single_kernel(x_ref, w_ref, b_ref, o_ref):
    # Whole problem fits in one VMEM tile: matmul (MXU) + bias + ReLU (VPU).
    acc = jnp.dot(x_ref[...], w_ref[...], preferred_element_type=jnp.float32)
    o_ref[...] = jnp.maximum(acc + b_ref[...], 0.0).astype(o_ref.dtype)


def _linear_relu_tiled_f32_kernel(x_ref, w_ref, b_ref, o_ref):
    # f32 output doubles as the accumulator: the output block is resident in
    # VMEM across the K axis because its index_map ignores k (K is the last,
    # "arbitrary" grid axis).  No scratch, no epilogue copy.
    k = pl.program_id(2)
    partial = jnp.dot(x_ref[...], w_ref[...], preferred_element_type=jnp.float32)

    @pl.when(k == 0)
    def _():
        o_ref[...] = partial          # direct write, no zero-init pass

    @pl.when(k > 0)
    def _():
        o_ref[...] += partial

    @pl.when(k == pl.num_programs(2) - 1)
    def _():
        o_ref[...] = jnp.maximum(o_ref[...] + b_ref[...], 0.0)


def _linear_relu_tiled_acc_kernel(x_ref, w_ref, b_ref, o_ref, acc_ref):
    # Narrow output dtype: keep an f32 scratch accumulator, cast on last k.
    k = pl.program_id(2)
    partial = jnp.dot(x_ref[...], w_ref[...], preferred_element_type=jnp.float32)

    @pl.when(k == 0)
    def _():
        acc_ref[...] = partial

    @pl.when(k > 0)
    def _():
        acc_ref[...] += partial

    @pl.when(k == pl.num_programs(2) - 1)
    def _():
        o_ref[...] = jnp.maximum(acc_ref[...] + b_ref[...], 0.0).astype(o_ref.dtype)


@functools.partial(jax.jit, static_argnames=("tm", "tn", "tk"))
def my_linear_relu(x, weight, bias, *, tm=256, tn=512, tk=512):
    """Pallas equivalent of MyLinear.forward: relu(x @ weight + bias).

    x:      (batch, in_features)
    weight: (in_features, out_features)
    bias:   (out_features,)
    """
    batch, in_f = x.shape
    in_f_w, out_f = weight.shape
    assert in_f == in_f_w
    assert bias.shape == (out_f,)
    out_dtype = x.dtype

    # Clamp tile sizes to the (alignment-rounded) problem so small shapes stay
    # a single block; keep them (8, 128)-aligned so tiled BlockSpecs are legal.
    tm = min(tm, _round_up(batch, 8))
    tn = min(tn, _round_up(out_f, 128))
    tk = min(tk, _round_up(in_f, 128))

    m_pad = _round_up(batch, tm)
    n_pad = _round_up(out_f, tn)
    k_pad = _round_up(in_f, tk)

    # Only pad when alignment actually requires it: jnp.pad is a full extra
    # HBM pass over the operand and the output slice adds another copy.
    need_x_pad = (m_pad != batch) or (k_pad != in_f)
    need_w_pad = (k_pad != in_f) or (n_pad != out_f)
    x_p = jnp.pad(x, ((0, m_pad - batch), (0, k_pad - in_f))) if need_x_pad else x
    w_p = jnp.pad(weight, ((0, k_pad - in_f), (0, n_pad - out_f))) if need_w_pad else weight
    b_p = (jnp.pad(bias, (0, n_pad - out_f)) if n_pad != out_f else bias).reshape(1, n_pad)

    grid = (m_pad // tm, n_pad // tn, k_pad // tk)
    itemsize = jnp.dtype(out_dtype).itemsize

    cost = pl.CostEstimate(
        flops=2 * m_pad * n_pad * k_pad,
        transcendentals=0,
        bytes_accessed=(m_pad * k_pad + k_pad * n_pad + n_pad + m_pad * n_pad) * itemsize,
    )

    # VMEM budget: double-buffered input/output tiles (+ f32 scratch if any),
    # with 2x headroom, capped at 48 MiB (safe on v7x's 64 MiB physical VMEM).
    footprint = 2 * (tm * tk + tk * tn + tn + tm * tn) * 4
    if out_dtype != jnp.float32:
        footprint += tm * tn * 4
    vmem_limit = int(min(max(2 * footprint, 32 << 20), 48 << 20))

    if grid == (1, 1, 1):
        # Fast path: no grid machinery, single full-array VMEM block.
        out_p = pl.pallas_call(
            _linear_relu_single_kernel,
            out_shape=jax.ShapeDtypeStruct((m_pad, n_pad), out_dtype),
            in_specs=[
                pl.BlockSpec(memory_space=pltpu.MemorySpace.VMEM),
                pl.BlockSpec(memory_space=pltpu.MemorySpace.VMEM),
                pl.BlockSpec(memory_space=pltpu.MemorySpace.VMEM),
            ],
            out_specs=pl.BlockSpec(memory_space=pltpu.MemorySpace.VMEM),
            compiler_params=pltpu.CompilerParams(vmem_limit_bytes=vmem_limit),
            cost_estimate=cost,
        )(x_p, w_p, b_p)
    else:
        if out_dtype == jnp.float32:
            kernel = _linear_relu_tiled_f32_kernel
            scratch = []
        else:
            kernel = _linear_relu_tiled_acc_kernel
            scratch = [pltpu.VMEM((tm, tn), jnp.float32)]
        out_p = pl.pallas_call(
            kernel,
            out_shape=jax.ShapeDtypeStruct((m_pad, n_pad), out_dtype),
            grid_spec=pltpu.PrefetchScalarGridSpec(
                num_scalar_prefetch=0,
                grid=grid,
                in_specs=[
                    pl.BlockSpec((tm, tk), lambda i, j, k: (i, k)),
                    pl.BlockSpec((tk, tn), lambda i, j, k: (k, j)),
                    pl.BlockSpec((1, tn), lambda i, j, k: (0, j)),
                ],
                out_specs=pl.BlockSpec((tm, tn), lambda i, j, k: (i, j)),
                scratch_shapes=scratch,
            ),
            compiler_params=pltpu.CompilerParams(
                dimension_semantics=("parallel", "parallel", "arbitrary"),
                vmem_limit_bytes=vmem_limit,
            ),
            cost_estimate=cost,
        )(x_p, w_p, b_p)

    if m_pad == batch and n_pad == out_f:
        return out_p
    return out_p[:batch, :out_f]


def _reference(x, weight, bias):
    lin = jnp.dot(
        x, weight,
        preferred_element_type=jnp.float32,
        precision=jax.lax.Precision.HIGHEST,
    ) + bias
    return jax.nn.relu(lin).astype(x.dtype)


if __name__ == "__main__":
    key = jax.random.PRNGKey(0)

    # --- Toy shape implied by the module: X is (2, 5), MyLinear(5, 3) -------
    in_features, out_features = 5, 3
    kx, kw = jax.random.split(key)
    x = jax.random.normal(kx, (2, in_features), dtype=jnp.float32)
    weight = jax.random.normal(kw, (in_features, out_features), dtype=jnp.float32)
    bias = jnp.zeros((out_features,), dtype=jnp.float32)

    out = my_linear_relu(x, weight, bias)
    jax.block_until_ready(out)
    ref = _reference(x, weight, bias)
    assert out.shape == (2, out_features)
    assert jnp.allclose(out, ref, atol=1e-4, rtol=1e-4)

    # --- Larger, tile-aligned shape to exercise the tiled multi-block path --
    # (512, 1024) @ (1024, 1024): grid = (2, 2, 2), no padding, no slicing.
    k1, k2, k3 = jax.random.split(jax.random.PRNGKey(1), 3)
    xb = jax.random.normal(k1, (512, 1024), dtype=jnp.float32)
    wb = jax.random.normal(k2, (1024, 1024), dtype=jnp.float32)
    bb = jax.random.normal(k3, (1024,), dtype=jnp.float32)

    out_big = my_linear_relu(xb, wb, bb)
    jax.block_until_ready(out_big)
    ref_big = _reference(xb, wb, bb)
    assert out_big.shape == (512, 1024)
    assert jnp.allclose(out_big, ref_big, atol=1e-2, rtol=1e-2)

    print("KERNEL_OK")
</pallas_src>

<mosaic_0001>
module attributes {stable_mosaic.version = 11 : i64} {
  func.func @_linear_relu_single_kernel(%arg0: memref<8x128xf32, #tpu.memory_space<vmem>>, %arg1: memref<128x128xf32, #tpu.memory_space<vmem>>, %arg2: memref<1x128xf32, #tpu.memory_space<vmem>>, %arg3: memref<8x128xf32, #tpu.memory_space<vmem>>) attributes {dimension_semantics = [], scalar_prefetch = 0 : i64, scratch_operands = 0 : i64, tpu.core_type = #tpu.core_type<tc>} {
    %c0 = arith.constant 0 : index
    %c0_0 = arith.constant 0 : index
    %0 = vector.load %arg0[%c0, %c0_0] : memref<8x128xf32, #tpu.memory_space<vmem>>, vector<8x128xf32>
    %c0_1 = arith.constant 0 : index
    %c0_2 = arith.constant 0 : index
    %1 = vector.load %arg1[%c0_1, %c0_2] : memref<128x128xf32, #tpu.memory_space<vmem>>, vector<128x128xf32>
    %cst = arith.constant dense<0.000000e+00> : vector<8x128xf32>
    %2 = tpu.matmul %0, %1, %cst {dimension_numbers = #tpu.dot_dimension_numbers<[1], [0], [0], [1], [0, 0, 1, 1], [], []>} : vector<8x128xf32>, vector<128x128xf32>, vector<8x128xf32> -> vector<8x128xf32>
    %c0_3 = arith.constant 0 : index
    %c0_4 = arith.constant 0 : index
    %3 = vector.load %arg2[%c0_3, %c0_4] : memref<1x128xf32, #tpu.memory_space<vmem>>, vector<1x128xf32>
    %4 = vector.broadcast %3 : vector<1x128xf32> to vector<8x128xf32>
    %5 = arith.addf %2, %4 : vector<8x128xf32>
    %cst_5 = arith.constant 0.000000e+00 : f32
    %6 = vector.broadcast %cst_5 : f32 to vector<8x128xf32>
    %7 = arith.maximumf %5, %6 : vector<8x128xf32>
    %c0_6 = arith.constant 0 : index
    %c0_7 = arith.constant 0 : index
    %8 = vector.load %arg3[%c0_6, %c0_7] : memref<8x128xf32, #tpu.memory_space<vmem>>, vector<8x128xf32>
    tpu.vector_store %arg3[%c0_6, %c0_7], %7 {strides = array<i32>} : memref<8x128xf32, #tpu.memory_space<vmem>>, vector<8x128xf32>,
    return
  }
}

</mosaic_0001>

<bundles_post_ra>
// kernel: my_linear_relu.1
= control target key start
LH: loop header
LB: loop body
LE: loop exit
PB: predicated region body
PF: predicated region fallthrough
CT: control target
= control target key end

     0   :  { %v194_v0 = vmov 0.0|0.0   ;;  %vm195_vm0 = vmmov 0   ;;  %v196_v4 = vmov 0.0   ;;  %s274_s1 = inlined_call_operand.vmem [shape: f32[128,128], index: 1, kind: input, shape index: {}]   ;;  %s275_s0 = inlined_call_operand.vmem [shape: f32[8,128], index: 0, kind: input, shape index: {}]   ;;  %s276_s2 = inlined_call_operand.vmem [shape: f32[1,128], index: 2, kind: input, shape index: {}]   ;;  %s277_s3 = inlined_call_operand.vmem [shape: f32[8,128], index: 3, kind: output, shape index: {}]  }
   0x1   :  { %167 = vmatprep.subr.bf16.mxu0 %v194_v0  ;;  %v15_v1 = vld [vmem:[%s274_s1] sm:$0xff]  ;;  %v16_v2 = vld [vmem:[%s274_s1 + $0x8] sm:$0xff]  ;;  %v17_v3 = vld [vmem:[%s274_s1 + $0x10] sm:$0xff]  ;;  %164 = vmatprep.mubr.msk.f32.mxu0 %vm195_vm0, %v196_v4 }
   0x2   :  { %v168_v5 = vpack.c.bf16 %v16_v2, %v15_v1  ;;  %v18_v6 = vld [vmem:[%s274_s1 + $0x18] sm:$0xff]  ;;  %v19_v8 = vld [vmem:[%s274_s1 + $0x20] sm:$0xff]  ;;  %v20_v9 = vld [vmem:[%s274_s1 + $0x28] sm:$0xff] }
   0x3   :  { %v171_v7 = vpack.c.bf16 %v18_v6, %v17_v3  ;;  %v174_v10 = vpack.c.bf16 %v20_v9, %v19_v8  ;;  %v21_v11 = vld [vmem:[%s274_s1 + $0x30] sm:$0xff]  ;;  %v22_v12 = vld [vmem:[%s274_s1 + $0x38] sm:$0xff]  ;;  %v23_v14 = vld [vmem:[%s274_s1 + $0x40] sm:$0xff] }
   0x4   :  { %169 = vmatpush3.bf16.msra.mxu0 %v168_v5  ;;  %v177_v13 = vpack.c.bf16 %v22_v12, %v21_v11  ;;  %v24_v15 = vld [vmem:[%s274_s1 + $0x48] sm:$0xff]  ;;  %v25_v17 = vld [vmem:[%s274_s1 + $0x50] sm:$0xff]  ;;  %v26_v18 = vld [vmem:[%s274_s1 + $0x58] sm:$0xff] }
   0x5   :  { %170 = vmatprep.subr.bf16.mxu0 %v194_v0  ;;  %v180_v16 = vpack.c.bf16 %v24_v15, %v23_v14  ;;  %v183_v19 = vpack.c.bf16 %v26_v18, %v25_v17  ;;  %v27_v20 = vld [vmem:[%s274_s1 + $0x60] sm:$0xff]  ;;  %v28_v21 = vld [vmem:[%s274_s1 + $0x68] sm:$0xff]  ;;  %v29_v23 = vld [vmem:[%s274_s1 + $0x70] sm:$0xff] }
   0x6   :  { %v186_v22 = vpack.c.bf16 %v28_v21, %v27_v20  ;;  %v30_v24 = vld [vmem:[%s274_s1 + $0x78] sm:$0xff]  ;;  %v14_v26 = vld [vmem:[%s275_s0] sm:$0xff] }
   0x7   :  { %v189_v25 = vpack.c.bf16 %v30_v24, %v29_v23  ;;  %v114_v27 = vld [vmem:[%s276_s2] ss:$0 sm:$0xff] }
   0x8   :  { %172 = vmatpush3.bf16.msra.mxu0 %v171_v7 }
   0x9   :  { %173 = vmatprep.subr.bf16.mxu0 %v194_v0 }
   0xc   :  { %175 = vmatpush3.bf16.msra.mxu0 %v174_v10 }
   0xd   :  { %176 = vmatprep.subr.bf16.mxu0 %v194_v0 }
  0x10   :  { %178 = vmatpush3.bf16.msra.mxu0 %v177_v13 }
  0x11   :  { %179 = vmatprep.subr.bf16.mxu0 %v194_v0 }
  0x14   :  { %181 = vmatpush3.bf16.msra.mxu0 %v180_v16 }
  0x15   :  { %182 = vmatprep.subr.bf16.mxu0 %v194_v0 }
  0x18   :  { %184 = vmatpush3.bf16.msra.mxu0 %v183_v19 }
  0x19   :  { %185 = vmatprep.subr.bf16.mxu0 %v194_v0 }
  0x1c   :  { %187 = vmatpush3.bf16.msra.mxu0 %v186_v22 }
  0x1d   :  { %188 = vmatprep.subr.bf16.mxu0 %v194_v0 }
  0x20   :  { %190 = vmatpush3.bf16.msra.mxu0 %v189_v25 }
  0x23   :  { %165 = vmatmul.mubr.f32.vlgmr.msra.gmra.mrb[0].mxu0 %v14_v26 }
  0xf6   :  { %v104_v28 = vpop.f32.mrb[0].mxu0 }
  0xf7   :  { %v105_v29 = vadd.f32 %v114_v27, %v104_v28  ;;  %v166_v30 = vpop.f32.mrb[1].mxu0 }
  0xf9   :  { %v108_v31 = vmax.f32 %v105_v29, 0.0 }
  0xfb   :  { %109 = vst [vmem:[%s277_s3] sm:$0xff] %v108_v31 }

</bundles_post_ra>
